<compile_context>
chip_gen: v7x
topology: tpu7x:2x2x1
jax: 0.10.0
libtpu: 0.0.40
codegen_flags: <defaults>
</compile_context>

<pallas_src>
import functools

import jax
import jax.numpy as jnp
from jax.experimental import pallas as pl
from jax.experimental.pallas import tpu as pltpu


def _round_up(v, m):
    return ((v + m - 1) // m) * m


def _vmem_capacity_bytes():
    try:
        return int(pltpu.get_tpu_info().vmem_capacity_bytes)
    except Exception:
        return 64 * 1024 * 1024  # conservative (v7x-sized) fallback


def _highway_kernel(x_ref, w_ref, b_ref, o_ref, *, e_pad):
    """One M-tile: fused proj+gate matmul, activations, highway combine."""
    x = x_ref[...]                                      # (tm, E), native dtype
    e = x.shape[-1]

    # Single MXU pass over the fused, pre-transposed (E, 2*E_pad) weight.
    # f32 accumulation; x is cast to the weight dtype (no-op unless large-E
    # bf16 fallback is active).
    y = jnp.dot(x.astype(w_ref.dtype), w_ref[...],
                preferred_element_type=jnp.float32)     # (tm, 2*E_pad) f32
    y = y + b_ref[...]                                  # bias kept in f32

    xf = x.astype(jnp.float32)
    proj = jnp.maximum(y[:, :e], 0.0)                   # relu    (VPU)
    gate = jax.nn.sigmoid(y[:, e_pad:e_pad + e])        # sigmoid (EUP slot)
    # Highway combine, 3 VALU ops: x + g*(p - x).  Kept in f32 for portability
    # (v5e has no bf16 VPU); the store casts back to the activation dtype.
    o_ref[...] = (xf + gate * (proj - xf)).astype(o_ref.dtype)


def highway_pallas(x, w_proj, b_proj, w_gate, b_gate, *, tile_m=None):
    """x: (L, B, E); w_*: (E, E) in PyTorch (out, in) convention; b_*: (E,)."""
    L, B, E = x.shape
    M = L * B
    out_dtype = x.dtype
    E_pad = max(128, _round_up(E, 128))

    x2d = x.reshape(M, E)            # activations stay at native E (no host pad)

    # ---- device-aware VMEM budget ------------------------------------------------
    cap = _vmem_capacity_bytes()
    if cap >= 128 * 1024 * 1024:                 # v5e / v6e (128 MiB physical)
        limit_cap = 96 * 1024 * 1024
    else:                                        # v7x (64 MiB physical per TC)
        limit_cap = min(cap - (10 << 20), 54 * 1024 * 1024)

    # ---- fused, pre-transposed weight (one-time host prep) ------------------------
    mm_dtype = x.dtype
    w_fused_bytes = E * (2 * E_pad) * jnp.dtype(mm_dtype).itemsize
    if mm_dtype == jnp.float32 and 2 * w_fused_bytes > limit_cap // 2:
        # Large-E fallback: halve the resident weight footprint / HBM fetch.
        # f32 accumulation keeps the accuracy impact negligible for this op.
        mm_dtype = jnp.bfloat16

    def _prep_w(w):          # (E, E) (out, in) -> (E, E_pad) in (in, out_pad) layout
        wt = w.T
        if E_pad != E:
            wt = jnp.pad(wt, ((0, 0), (0, E_pad - E)))
        return wt

    def _prep_b(b):
        return jnp.pad(b, (0, E_pad - E)) if E_pad != E else b

    w_cat = jnp.concatenate([_prep_w(w_proj), _prep_w(w_gate)],
                            axis=1).astype(mm_dtype)            # (E, 2*E_pad)
    b_cat = jnp.concatenate([_prep_b(b_proj), _prep_b(b_gate)])
    b_cat = b_cat.reshape(1, 2 * E_pad).astype(jnp.float32)     # (1, 2*E_pad)

    x_item = jnp.dtype(x.dtype).itemsize
    o_item = jnp.dtype(out_dtype).itemsize
    w_item = jnp.dtype(mm_dtype).itemsize

    w_fixed_1 = w_cat.size * w_item + b_cat.size * 4   # single-buffered residents
    w_fixed_2 = 2 * w_fixed_1                          # worst case (double-buffered)

    # Per pipelined row: double-buffered x + out tiles, plus f32 temporaries
    # (y / proj / gate / combine) of width 2*E_pad.
    per_row = 2 * E * x_item + 2 * E * o_item + 3 * (2 * E_pad) * 4

    # ---- tile selection ------------------------------------------------------------
    if tile_m is None:
        avail = max(limit_cap - w_fixed_2 - (8 << 20), per_row * 8)
        tm = min(avail // per_row, 4096)
        if M > 512:
            # Keep >= 2 grid steps so the "parallel" axis can shard across
            # TensorCores (v7x megacore) and the pipeline actually overlaps.
            tm = min(tm, _round_up(pl.cdiv(M, 2), 256))
        tm = (tm // 256) * 256 if tm >= 256 else max((tm // 8) * 8, 8)
        tile_m = int(tm)
    if tile_m >= M:
        tile_m = M                      # full-dim block: no (8,128) divisibility rule
    else:
        tile_m = max((int(tile_m) // 8) * 8, 8)  # align user-supplied tiles to 8 rows

    grid = (pl.cdiv(M, tile_m),)
    vmem_limit = int(min(max(w_fixed_2 + tile_m * per_row + (8 << 20), 32 << 20),
                         limit_cap))

    kernel = functools.partial(_highway_kernel, e_pad=E_pad)
    cost = pl.CostEstimate(
        flops=2 * M * E * (2 * E_pad),
        transcendentals=M * E,
        bytes_accessed=(M * E * x_item + M * E * o_item
                        + w_cat.size * w_item + b_cat.size * 4),
    )

    def _build(weight_pipeline_mode):
        if weight_pipeline_mode is None:
            w_spec = pl.BlockSpec((E, 2 * E_pad), lambda i: (0, 0))
            b_spec = pl.BlockSpec((1, 2 * E_pad), lambda i: (0, 0))
        else:
            w_spec = pl.BlockSpec((E, 2 * E_pad), lambda i: (0, 0),
                                  pipeline_mode=weight_pipeline_mode)
            b_spec = pl.BlockSpec((1, 2 * E_pad), lambda i: (0, 0),
                                  pipeline_mode=weight_pipeline_mode)
        return pl.pallas_call(
            kernel,
            out_shape=jax.ShapeDtypeStruct((M, E), out_dtype),
            grid_spec=pltpu.PrefetchScalarGridSpec(
                num_scalar_prefetch=0,
                grid=grid,
                in_specs=[
                    pl.BlockSpec((tile_m, E), lambda i: (i, 0)),   # x row tile
                    w_spec,                                        # resident fused W
                    b_spec,                                        # resident fused bias
                ],
                out_specs=pl.BlockSpec((tile_m, E), lambda i: (i, 0)),
            ),
            compiler_params=pltpu.CompilerParams(
                dimension_semantics=("parallel",),
                vmem_limit_bytes=vmem_limit,
            ),
            cost_estimate=cost,
        )

    try:
        # Resident weights never change across grid steps -> single-buffer them.
        out2d = _build(pl.Buffered(1))(x2d, w_cat, b_cat)
    except Exception:
        # JAX versions without BlockSpec pipeline_mode support: default pipeline.
        out2d = _build(None)(x2d, w_cat, b_cat)

    return out2d.reshape(L, B, E)


def highway_ref(x, w_proj, b_proj, w_gate, b_gate):
    """Pure-JAX reference mirroring the PyTorch forward."""
    x_proj = jax.nn.relu(jnp.einsum("lbe,oe->lbo", x, w_proj) + b_proj)
    x_gate = jax.nn.sigmoid(jnp.einsum("lbe,oe->lbo", x, w_gate) + b_gate)
    return x_gate * x_proj + (1.0 - x_gate) * x


def _make_params(key, E, dtype=jnp.float32):
    bound = 1.0 / (E ** 0.5)
    k1, k2, k3, k4 = jax.random.split(key, 4)
    w_p = jax.random.uniform(k1, (E, E), minval=-bound, maxval=bound, dtype=dtype)
    b_p = jax.random.uniform(k2, (E,),   minval=-bound, maxval=bound, dtype=dtype)
    w_g = jax.random.uniform(k3, (E, E), minval=-bound, maxval=bound, dtype=dtype)
    b_g = jax.random.uniform(k4, (E,),   minval=-bound, maxval=bound, dtype=dtype)
    return w_p, b_p, w_g, b_g


if __name__ == "__main__":
    key = jax.random.PRNGKey(0)
    kx1, kp1, kx2, kp2, kx3, kp3 = jax.random.split(key, 6)

    # 1) Small module-scale shapes (max_sentence_length, batch, embed) = (8, 2, 32):
    #    E < 128 -> masked-lane output path, single grid step.
    L, B, E = 8, 2, 32
    x = jax.random.normal(kx1, (L, B, E), dtype=jnp.float32)
    params = _make_params(kp1, E)
    out = jax.block_until_ready(highway_pallas(x, *params))
    ref = highway_ref(x, *params)
    assert out.shape == (L, B, E)
    assert jnp.allclose(out, ref, atol=1e-5, rtol=1e-5), "mismatch (small E path)"

    # 2) Lane-dense E, M large enough to auto-tile into a multi-step parallel grid.
    L2, B2, E2 = 64, 16, 256
    x2 = jax.random.normal(kx2, (L2, B2, E2), dtype=jnp.float32)
    params2 = _make_params(kp2, E2)
    out2 = jax.block_until_ready(highway_pallas(x2, *params2))
    ref2 = highway_ref(x2, *params2)
    assert out2.shape == (L2, B2, E2)
    assert jnp.allclose(out2, ref2, atol=1e-4, rtol=1e-4), "mismatch (tiled path)"

    # 3) E > 128 and not a multiple of 128: padded weight halves, native-E activations.
    L3, B3, E3 = 24, 8, 200
    x3 = jax.random.normal(kx3, (L3, B3, E3), dtype=jnp.float32)
    params3 = _make_params(kp3, E3)
    out3 = jax.block_until_ready(highway_pallas(x3, *params3))
    ref3 = highway_ref(x3, *params3)
    assert out3.shape == (L3, B3, E3)
    assert jnp.allclose(out3, ref3, atol=1e-4, rtol=1e-4), "mismatch (unaligned E path)"

    print("KERNEL_OK")
</pallas_src>

<mosaic_0001>
module attributes {stable_mosaic.version = 11 : i64} {
  func.func @_highway_kernel(%arg0: i32, %arg1: memref<16x32xf32, #tpu.memory_space<vmem>>, %arg2: memref<32x256xf32, #tpu.memory_space<vmem>>, %arg3: memref<1x256xf32, #tpu.memory_space<vmem>>, %arg4: memref<16x32xf32, #tpu.memory_space<vmem>>) attributes {dimension_semantics = [#tpu.dimension_semantics<parallel>], iteration_bounds = array<i64: 1>, scalar_prefetch = 0 : i64, scratch_operands = 0 : i64, tpu.core_type = #tpu.core_type<tc>, window_params = [{transform_indices = @transform_0, window_bounds = array<i64: 16, 32>}, {pipeline_mode = #tpu.pipeline_mode<synchronous>, transform_indices = @transform_1, window_bounds = array<i64: 32, 256>}, {pipeline_mode = #tpu.pipeline_mode<synchronous>, transform_indices = @transform_2, window_bounds = array<i64: 1, 256>}, {transform_indices = @transform_3, window_bounds = array<i64: 16, 32>}]} {
    %c0 = arith.constant 0 : index
    %c0_0 = arith.constant 0 : index
    %0 = vector.load %arg1[%c0, %c0_0] : memref<16x32xf32, #tpu.memory_space<vmem>>, vector<16x32xf32>
    %c0_1 = arith.constant 0 : index
    %c0_2 = arith.constant 0 : index
    %1 = vector.load %arg2[%c0_1, %c0_2] : memref<32x256xf32, #tpu.memory_space<vmem>>, vector<32x256xf32>
    %cst = arith.constant dense<0.000000e+00> : vector<16x256xf32>
    %2 = tpu.matmul %0, %1, %cst {dimension_numbers = #tpu.dot_dimension_numbers<[1], [0], [0], [1], [0, 0, 1, 1], [], []>} : vector<16x32xf32>, vector<32x256xf32>, vector<16x256xf32> -> vector<16x256xf32>
    %c0_3 = arith.constant 0 : index
    %c0_4 = arith.constant 0 : index
    %3 = vector.load %arg3[%c0_3, %c0_4] : memref<1x256xf32, #tpu.memory_space<vmem>>, vector<1x256xf32>
    %4 = vector.broadcast %3 : vector<1x256xf32> to vector<16x256xf32>
    %5 = arith.addf %2, %4 : vector<16x256xf32>
    %6 = vector.extract_strided_slice %5 {offsets = [0, 0], sizes = [16, 32], strides = [1, 1]} : vector<16x256xf32> to vector<16x32xf32>
    %cst_5 = arith.constant 0.000000e+00 : f32
    %7 = vector.broadcast %cst_5 : f32 to vector<16x32xf32>
    %8 = arith.maximumf %6, %7 : vector<16x32xf32>
    %9 = vector.extract_strided_slice %5 {offsets = [0, 128], sizes = [16, 32], strides = [1, 1]} : vector<16x256xf32> to vector<16x32xf32>
    %10 = arith.negf %9 : vector<16x32xf32>
    %11 = math.exp %10 : vector<16x32xf32>
    %cst_6 = arith.constant 1.000000e+00 : f32
    %12 = vector.broadcast %cst_6 : f32 to vector<16x32xf32>
    %13 = arith.addf %12, %11 : vector<16x32xf32>
    %14 = arith.divf %12, %13 : vector<16x32xf32>
    %15 = arith.subf %8, %0 : vector<16x32xf32>
    %16 = arith.mulf %14, %15 : vector<16x32xf32>
    %17 = arith.addf %0, %16 : vector<16x32xf32>
    %c0_7 = arith.constant 0 : index
    %c0_8 = arith.constant 0 : index
    %18 = vector.load %arg4[%c0_7, %c0_8] : memref<16x32xf32, #tpu.memory_space<vmem>>, vector<16x32xf32>
    tpu.vector_store %arg4[%c0_7, %c0_8], %17 {strides = array<i32>} : memref<16x32xf32, #tpu.memory_space<vmem>>, vector<16x32xf32>,
    return
  }
  func.func @transform_0(%arg0: i32) -> (i32, i32) {
    %c0_i32 = arith.constant 0 : i32
    %c0_i32_0 = arith.constant 0 : i32
    return %arg0, %c0_i32 : i32, i32
  }
  func.func @transform_1(%arg0: i32) -> (i32, i32) {
    %c0_i32 = arith.constant 0 : i32
    %c0_i32_0 = arith.constant 0 : i32
    %c0_i32_1 = arith.constant 0 : i32
    return %c0_i32, %c0_i32_0 : i32, i32
  }
  func.func @transform_2(%arg0: i32) -> (i32, i32) {
    %c0_i32 = arith.constant 0 : i32
    %c0_i32_0 = arith.constant 0 : i32
    %c0_i32_1 = arith.constant 0 : i32
    return %c0_i32, %c0_i32_0 : i32, i32
  }
  func.func @transform_3(%arg0: i32) -> (i32, i32) {
    %c0_i32 = arith.constant 0 : i32
    %c0_i32_0 = arith.constant 0 : i32
    return %arg0, %c0_i32 : i32, i32
  }
}

module attributes {stable_mosaic.version = 11 : i64} {
  func.func @_highway_kernel(%arg0: i32, %arg1: memref<16x32xf32, #tpu.memory_space<vmem>>, %arg2: memref<32x256xf32, #tpu.memory_space<vmem>>, %arg3: memref<1x256xf32, #tpu.memory_space<vmem>>, %arg4: memref<16x32xf32, #tpu.memory_space<vmem>>) attributes {dimension_semantics = [#tpu.dimension_semantics<parallel>], iteration_bounds = array<i64: 1>, scalar_prefetch = 0 : i64, scratch_operands = 0 : i64, tpu.core_type = #tpu.core_type<tc>, window_params = [{transform_indices = @transform_0, window_bounds = array<i64: 16, 32>}, {pipeline_mode = #tpu.pipeline_mode<synchronous>, transform_indices = @transform_1, window_bounds = array<i64: 32, 256>}, {pipeline_mode = #tpu.pipeline_mode<synchronous>, transform_indices = @transform_2, window_bounds = array<i64: 1, 256>}, {transform_indices = @transform_3, window_bounds = array<i64: 16, 32>}]} {
    %c0 = arith.constant 0 : index
    %c0_0 = arith.constant 0 : index
    %0 = vector.load %arg1[%c0, %c0_0] : memref<16x32xf32, #tpu.memory_space<vmem>>, vector<16x32xf32>
    %c0_1 = arith.constant 0 : index
    %c0_2 = arith.constant 0 : index
    %1 = vector.load %arg2[%c0_1, %c0_2] : memref<32x256xf32, #tpu.memory_space<vmem>>, vector<32x256xf32>
    %cst = arith.constant dense<0.000000e+00> : vector<16x256xf32>
    %2 = tpu.matmul %0, %1, %cst {dimension_numbers = #tpu.dot_dimension_numbers<[1], [0], [0], [1], [0, 0, 1, 1], [], []>} : vector<16x32xf32>, vector<32x256xf32>, vector<16x256xf32> -> vector<16x256xf32>
    %c0_3 = arith.constant 0 : index
    %c0_4 = arith.constant 0 : index
    %3 = vector.load %arg3[%c0_3, %c0_4] : memref<1x256xf32, #tpu.memory_space<vmem>>, vector<1x256xf32>
    %4 = vector.broadcast %3 : vector<1x256xf32> to vector<16x256xf32>
    %5 = arith.addf %2, %4 : vector<16x256xf32>
    %6 = vector.extract_strided_slice %5 {offsets = [0, 0], sizes = [16, 32], strides = [1, 1]} : vector<16x256xf32> to vector<16x32xf32>
    %cst_5 = arith.constant 0.000000e+00 : f32
    %7 = vector.broadcast %cst_5 : f32 to vector<16x32xf32>
    %8 = arith.maximumf %6, %7 : vector<16x32xf32>
    %9 = vector.extract_strided_slice %5 {offsets = [0, 128], sizes = [16, 32], strides = [1, 1]} : vector<16x256xf32> to vector<16x32xf32>
    %10 = arith.negf %9 : vector<16x32xf32>
    %11 = math.exp %10 : vector<16x32xf32>
    %cst_6 = arith.constant 1.000000e+00 : f32
    %12 = vector.broadcast %cst_6 : f32 to vector<16x32xf32>
    %13 = arith.addf %12, %11 : vector<16x32xf32>
    %14 = arith.divf %12, %13 : vector<16x32xf32>
    %15 = arith.subf %8, %0 : vector<16x32xf32>
    %16 = arith.mulf %14, %15 : vector<16x32xf32>
    %17 = arith.addf %0, %16 : vector<16x32xf32>
    %c0_7 = arith.constant 0 : index
    %c0_8 = arith.constant 0 : index
    %18 = vector.load %arg4[%c0_7, %c0_8] : memref<16x32xf32, #tpu.memory_space<vmem>>, vector<16x32xf32>
    tpu.vector_store %arg4[%c0_7, %c0_8], %17 {strides = array<i32>} : memref<16x32xf32, #tpu.memory_space<vmem>>, vector<16x32xf32>,
    return
  }
  func.func @transform_0(%arg0: i32) -> (i32, i32) {
    %c0_i32 = arith.constant 0 : i32
    %c0_i32_0 = arith.constant 0 : i32
    return %arg0, %c0_i32 : i32, i32
  }
  func.func @transform_1(%arg0: i32) -> (i32, i32) {
    %c0_i32 = arith.constant 0 : i32
    %c0_i32_0 = arith.constant 0 : i32
    %c0_i32_1 = arith.constant 0 : i32
    return %c0_i32, %c0_i32_0 : i32, i32
  }
  func.func @transform_2(%arg0: i32) -> (i32, i32) {
    %c0_i32 = arith.constant 0 : i32
    %c0_i32_0 = arith.constant 0 : i32
    %c0_i32_1 = arith.constant 0 : i32
    return %c0_i32, %c0_i32_0 : i32, i32
  }
  func.func @transform_3(%arg0: i32) -> (i32, i32) {
    %c0_i32 = arith.constant 0 : i32
    %c0_i32_0 = arith.constant 0 : i32
    return %arg0, %c0_i32 : i32, i32
  }
}

</mosaic_0001>

<bundles_post_ra>
// kernel: tpu_custom_call.1
= control target key start
LH: loop header
LB: loop body
LE: loop exit
PB: predicated region body
PF: predicated region fallthrough
CT: control target
= control target key end

     0   :  { %8 = vsyncpa [#allocation3], 0  ;;  %s370_s0 = inlined_call_operand.hbm [shape: f32[16,32], index: 0, kind: input, shape index: {}]   ;;  %s371_s1 = inlined_call_operand.hbm [shape: f32[32,256], index: 1, kind: input, shape index: {}]   ;;  %s372_s2 = inlined_call_operand.vmem [shape: f32[1,256], index: 2, kind: input, shape index: {}]   ;;  %s373_s3 = inlined_call_operand.hbm [shape: f32[16,32], index: 3, kind: output, shape index: {}]  }
   0x1   :  { %9 = vsyncpa [#allocation6], 0 }
   0x2   :  { %10 = vsyncpa [#allocation4], 0  ;;  %s293_s12 = smov [#allocation2]   ;;  %s221_s16 = scalar_lea.hbm %s370_s0, 256 }
   0x3   :  { %s16_s13 = sshll.u32 %s293_s12, 4  ;;  %p222_p0 = scmp.ne.s32.totalorder %s370_s0, %s221_s16  ;;  %s17_s13 = int_to_ptr.vmem [resolvable:$true] %s16_s13 }
   0x4   :  { %p225_p1 = scmp.lt.u32.totalorder %s221_s16, %s370_s0 }
   0x6   :  { %p227_p2 = pnand %p225_p1, %p222_p0 }
   0x8   :  { %230 = shalt.err (!%p227_p2)
}
   0x9   :  { %s231_s21 = scalar_lea.vmem %s17_s13, 256  ;;  %p236_p4 = scmp.lt.s32.totalorder %s17_s13, %s17_s13 }
   0xa   :  { %p232_p3 = scmp.ne.s32.totalorder %s17_s13, %s231_s21  ;;  %p237_p5 = scmp.lt.s32.totalorder %s231_s21, %s231_s21 }
   0xc   :  { %p238_p6 = por %p237_p5, %p236_p4 }
   0xe   :  { %p239_p7 = pnand %p238_p6, %p232_p3 }
  0x10   :  { %242 = shalt.err (!%p239_p7)
}
  0x11   :  { %s294_s22 = smov 128   ;;  %s295_s23 = smov 8  }
  0x12   :  { %22 = dma.hbm_to_vmem [thread:$0]  %s370_s0, 256, %s17_s13, [#allocation3], %s294_s22, %s294_s22, %s295_s23  }
  0x13   :  { %s296_s26 = smov [#allocation5]   ;;  %s243_s30 = scalar_lea.hbm %s371_s1, 1024 }
  0x14   :  { %s28_s27 = sshll.u32 %s296_s26, 4  ;;  %p244_p8 = scmp.ne.s32.totalorder %s371_s1, %s243_s30  ;;  %s29_s27 = int_to_ptr.vmem [resolvable:$true] %s28_s27 }
  0x15   :  { %p247_p9 = scmp.lt.u32.totalorder %s243_s30, %s371_s1 }
  0x17   :  { %p249_p10 = pnand %p247_p9, %p244_p8 }
  0x19   :  { %252 = shalt.err (!%p249_p10)
}
  0x1a   :  { %s253_s8 = scalar_lea.vmem %s29_s27, 1024  ;;  %p258_p12 = scmp.lt.s32.totalorder %s29_s27, %s29_s27 }
  0x1b   :  { %p254_p11 = scmp.ne.s32.totalorder %s29_s27, %s253_s8  ;;  %p259_p13 = scmp.lt.s32.totalorder %s253_s8, %s253_s8 }
  0x1d   :  { %p260_p0 = por %p259_p13, %p258_p12 }
  0x1f   :  { %p261_p1 = pnand %p260_p0, %p254_p11 }
  0x21   :  { %264 = shalt.err (!%p261_p1)
}
  0x22   :  { %s297_s0 = smov 256   ;;  %s298_s9 = smov 16  }
  0x23   :  { %34 = dma.hbm_to_vmem [thread:$0]  %s371_s1, 1024, %s29_s27, [#allocation6], %s297_s0, %s297_s0, %s298_s9  }
  0x24   :  { %287 = dma.done.wait [#allocation3], 256  }
  0x25   :  { %288 = vsyncadd [#allocation3], 4294967040 }
  0x26   :  { %289 = dma.done.wait [#allocation6], 1024  }
  0x27   :  { %290 = vsyncadd [#allocation6], 4294966272  ;;  %v299_v0 = vmov 0.0   ;;  %v46_v1 = vld [vmem:[#allocation5 + $0x8] sm:$0xff]  ;;  %v48_v2 = vld [vmem:[#allocation5 + $0x18] sm:$0xff]  ;;  %vm65_vm0 = vcmask 261120   ;;  %v55_v15 = vlaneseq }
  0x28   :  { %136 = vmatprep.mubr.f32.mxu0 %v299_v0  ;;  %142 = vmatprep.mubr.f32.mxu1 %v299_v0  ;;  %v45_v3 = vld [vmem:[#allocation5] sm:$0xff]  ;;  %v193_v4 = vpack.c.bf16 %v48_v2, %v46_v1  ;;  %v47_v5 = vld [vmem:[#allocation5 + $0x10] sm:$0xff]  ;;  %v50_v6 = vld [vmem:[#allocation5 + $0x28] sm:$0xff] }
  0x29   :  { %v52_v7 = vld [vmem:[#allocation5 + $0x38] sm:$0xff]  ;;  %v195_v8 = vpack.c.bf16 %v47_v5, %v45_v3  ;;  %v49_v10 = vld [vmem:[#allocation5 + $0x20] sm:$0xff]  ;;  %v51_v11 = vld [vmem:[#allocation5 + $0x30] sm:$0xff]  ;;  %v56_v16 = vshrl.u32 %v55_v15, 7 }
  0x2a   :  { %v197_v9 = vpack.c.bf16 %v52_v7, %v50_v6  ;;  %194 = vmatprep.subr.bf16.mxu0 %v193_v4  ;;  %201 = vmatprep.subr.bf16.mxu1 %v193_v4  ;;  %v199_v12 = vpack.c.bf16 %v51_v11, %v49_v10  ;;  %v43_v13 = vld [vmem:[#allocation2] sm:$0xff]  ;;  %v44_v14 = vld [vmem:[#allocation2 + $0x8] sm:$0xff] }
  0x2b   :  { %196 = vmatpush1.bf16.msra.mxu0 %v195_v8  ;;  %203 = vmatpush1.bf16.msra.mxu1 %v195_v8  ;;  %v61_v17 = vsub.s32 1, %v56_v16  ;;  %v53_v18 = vld [vmem:[%s372_s2] sm:$0x3]  ;;  %v57_v28 = vsub.s32 0, %v56_v16  ;;  %s300_s2 = smov [#allocation7]  }
  0x2c   :  { %198 = vmatprep.subr.bf16.mxu0 %v197_v9  ;;  %202 = vmatprep.subr.bf16.mxu1 %v197_v9  ;;  %s176_s13 = sshll.u32 %s300_s2, 4  ;;  %s177_s13 = int_to_ptr.vmem [resolvable:$true] %s176_s13 }
  0x2d   :  { %v62_v19 = vrot.slane %v53_v18, %v61_v17  ;;  %v58_v30 = vrot.slane %v53_v18, %v57_v28  ;;  %s265_s14 = scalar_lea.vmem %s177_s13, 256  ;;  %p270_p3 = scmp.lt.s32.totalorder %s177_s13, %s177_s13 }
  0x2e   :  { %p266_p2 = scmp.ne.s32.totalorder %s177_s13, %s265_s14  ;;  %p271_p4 = scmp.lt.s32.totalorder %s265_s14, %s265_s14 }
  0x2f   :  { %200 = vmatpush1.bf16.msra.mxu0 %v199_v12  ;;  %204 = vmatpush1.bf16.msra.mxu1 %v199_v12 }
  0x30   :  { %p272_p5 = por %p271_p4, %p270_p3 }
  0x32   :  { %189 = vmatmul.mubr.msk.f32.vlgmr.msra.gmra.mrb[0].mxu0 %vm65_vm0, %v43_v13  ;;  %190 = vmatmul.mubr.msk.f32.vlgmr.msra.gmra.mrb[0].mxu1 %vm65_vm0, %v44_v14  ;;  %p273_p6 = pnand %p272_p5, %p266_p2 }
 0x105   :  { %v138_v20 = vpop.f32.mrb[0].mxu0  ;;  %v144_v21 = vpop.f32.mrb[0].mxu1 }
 0x106   :  { %v140_v22 = vpop.f32.mrb[1].mxu0  ;;  %v146_v23 = vpop.f32.mrb[1].mxu1  ;;  %v139_v34 = vadd.f32 %v138_v20, %v58_v30  ;;  %v145_v35 = vadd.f32 %v144_v21, %v58_v30 }
 0x107   :  { %v141_v24 = vadd.f32 %v140_v22, %v62_v19  ;;  %v147_v25 = vadd.f32 %v146_v23, %v62_v19 }
 0x108   :  { %v149_v36 = vmax.f32 %v139_v34, 0.0  ;;  %v150_v37 = vmax.f32 %v145_v35, 0.0 }
 0x109   :  { %v191_v26 = vmul.f32 -1.442695, %v141_v24  ;;  %v192_v27 = vmul.f32 -1.442695, %v147_v25 }
 0x10a   :  { %v163_v38 = vsub.f32 %v149_v36, %v43_v13  ;;  %v164_v40 = vsub.f32 %v150_v37, %v44_v14 }
 0x10b   :  { %213 = vpow2.f32 %v191_v26 }
 0x10c   :  { %215 = vpow2.f32 %v192_v27 }
 0x115   :  { %v214_v29 = vpop.eup %213 }
 0x116   :  { %v216_v31 = vpop.eup %215  ;;  %v157_v32 = vadd.f32 1.0, %v214_v29 }
 0x117   :  { %v158_v33 = vadd.f32 1.0, %v216_v31 }
 0x118   :  { %217 = vrcp.f32 %v157_v32 }
 0x119   :  { %219 = vrcp.f32 %v158_v33 }
 0x122   :  { %v218_v39 = vpop.eup %217 }
 0x123   :  { %v220_v41 = vpop.eup %219  ;;  %v165_v42 = vmul.f32 %v218_v39, %v163_v38 }
 0x124   :  { %v166_v43 = vmul.f32 %v220_v41, %v164_v40 }
 0x125   :  { %v167_v44 = vadd.f32 %v165_v42, %v43_v13 }
 0x126   :  { %v168_v45 = vadd.f32 %v166_v43, %v44_v14 }
 0x127   :  { %169 = vst.msk [vmem:[#allocation7] sm:$0xff] %vm65_vm0, %v167_v44 }
 0x128   :  { %170 = vst.msk [vmem:[#allocation7 + $0x8] sm:$0xff] %vm65_vm0, %v168_v45 }
 0x129   :  { %276 = shalt.err (!%p273_p6)
}
 0x12a   :  { %s277_s17 = scalar_lea.hbm %s373_s3, 256 }
 0x12b   :  { %p278_p7 = scmp.ne.s32.totalorder %s373_s3, %s277_s17  ;;  %p281_p8 = scmp.lt.u32.totalorder %s277_s17, %s373_s3 }
 0x12d   :  { %p283_p9 = pnand %p281_p8, %p278_p7 }
 0x12f   :  { %286 = shalt.err (!%p283_p9)
}
 0x130   :  { %182 = dma.vmem_to_hbm [thread:$0]  %s177_s13, 256, %s373_s3, [#allocation4], %s294_s22, %s294_s22, %s295_s23  }
 0x131   :  { %291 = dma.done.wait [#allocation4], 256  }
 0x132   :  { %292 = vsyncadd [#allocation4], 4294967040 }
 0x133   :  { %186 = vsyncpa [#allocation3], 1 }
 0x134   :  { %187 = vsyncpa [#allocation6], 1 }
 0x135   :  { %188 = vsyncpa [#allocation4], 1 }

// kernel: tpu_custom_call.1
= control target key start
LH: loop header
LB: loop body
LE: loop exit
PB: predicated region body
PF: predicated region fallthrough
CT: control target
= control target key end

     0   :  { %8 = vsyncpa [#allocation3], 0  ;;  %s370_s0 = inlined_call_operand.hbm [shape: f32[16,32], index: 0, kind: input, shape index: {}]   ;;  %s371_s1 = inlined_call_operand.hbm [shape: f32[32,256], index: 1, kind: input, shape index: {}]   ;;  %s372_s2 = inlined_call_operand.vmem [shape: f32[1,256], index: 2, kind: input, shape index: {}]   ;;  %s373_s3 = inlined_call_operand.hbm [shape: f32[16,32], index: 3, kind: output, shape index: {}]  }
   0x1   :  { %9 = vsyncpa [#allocation6], 0 }
   0x2   :  { %10 = vsyncpa [#allocation4], 0  ;;  %s293_s12 = smov [#allocation2]   ;;  %s221_s16 = scalar_lea.hbm %s370_s0, 256 }
   0x3   :  { %s16_s13 = sshll.u32 %s293_s12, 4  ;;  %p222_p0 = scmp.ne.s32.totalorder %s370_s0, %s221_s16  ;;  %s17_s13 = int_to_ptr.vmem [resolvable:$true] %s16_s13 }
   0x4   :  { %p225_p1 = scmp.lt.u32.totalorder %s221_s16, %s370_s0 }
   0x6   :  { %p227_p2 = pnand %p225_p1, %p222_p0 }
   0x8   :  { %230 = shalt.err (!%p227_p2)
}
   0x9   :  { %s231_s21 = scalar_lea.vmem %s17_s13, 256  ;;  %p236_p4 = scmp.lt.s32.totalorder %s17_s13, %s17_s13 }
   0xa   :  { %p232_p3 = scmp.ne.s32.totalorder %s17_s13, %s231_s21  ;;  %p237_p5 = scmp.lt.s32.totalorder %s231_s21, %s231_s21 }
   0xc   :  { %p238_p6 = por %p237_p5, %p236_p4 }
   0xe   :  { %p239_p7 = pnand %p238_p6, %p232_p3 }
  0x10   :  { %242 = shalt.err (!%p239_p7)
}
  0x11   :  { %s294_s22 = smov 128   ;;  %s295_s23 = smov 8  }
  0x12   :  { %22 = dma.hbm_to_vmem [thread:$0]  %s370_s0, 256, %s17_s13, [#allocation3], %s294_s22, %s294_s22, %s295_s23  }
  0x13   :  { %s296_s26 = smov [#allocation5]   ;;  %s243_s30 = scalar_lea.hbm %s371_s1, 1024 }
  0x14   :  { %s28_s27 = sshll.u32 %s296_s26, 4  ;;  %p244_p8 = scmp.ne.s32.totalorder %s371_s1, %s243_s30  ;;  %s29_s27 = int_to_ptr.vmem [resolvable:$true] %s28_s27 }
  0x15   :  { %p247_p9 = scmp.lt.u32.totalorder %s243_s30, %s371_s1 }
  0x17   :  { %p249_p10 = pnand %p247_p9, %p244_p8 }
  0x19   :  { %252 = shalt.err (!%p249_p10)
}
  0x1a   :  { %s253_s8 = scalar_lea.vmem %s29_s27, 1024  ;;  %p258_p12 = scmp.lt.s32.totalorder %s29_s27, %s29_s27 }
  0x1b   :  { %p254_p11 = scmp.ne.s32.totalorder %s29_s27, %s253_s8  ;;  %p259_p13 = scmp.lt.s32.totalorder %s253_s8, %s253_s8 }
  0x1d   :  { %p260_p0 = por %p259_p13, %p258_p12 }
  0x1f   :  { %p261_p1 = pnand %p260_p0, %p254_p11 }
  0x21   :  { %264 = shalt.err (!%p261_p1)
}
  0x22   :  { %s297_s0 = smov 256   ;;  %s298_s9 = smov 16  }
  0x23   :  { %34 = dma.hbm_to_vmem [thread:$0]  %s371_s1, 1024, %s29_s27, [#allocation6], %s297_s0, %s297_s0, %s298_s9  }
  0x24   :  { %287 = dma.done.wait [#allocation3], 256  }
  0x25   :  { %288 = vsyncadd [#allocation3], 4294967040 }
  0x26   :  { %289 = dma.done.wait [#allocation6], 1024  }
  0x27   :  { %290 = vsyncadd [#allocation6], 4294966272  ;;  %v299_v0 = vmov 0.0   ;;  %v46_v1 = vld [vmem:[#allocation5 + $0x8] sm:$0xff]  ;;  %v48_v2 = vld [vmem:[#allocation5 + $0x18] sm:$0xff]  ;;  %vm65_vm0 = vcmask 261120   ;;  %v55_v15 = vlaneseq }
  0x28   :  { %136 = vmatprep.mubr.f32.mxu0 %v299_v0  ;;  %142 = vmatprep.mubr.f32.mxu1 %v299_v0  ;;  %v45_v3 = vld [vmem:[#allocation5] sm:$0xff]  ;;  %v193_v4 = vpack.c.bf16 %v48_v2, %v46_v1  ;;  %v47_v5 = vld [vmem:[#allocation5 + $0x10] sm:$0xff]  ;;  %v50_v6 = vld [vmem:[#allocation5 + $0x28] sm:$0xff] }
  0x29   :  { %v52_v7 = vld [vmem:[#allocation5 + $0x38] sm:$0xff]  ;;  %v195_v8 = vpack.c.bf16 %v47_v5, %v45_v3  ;;  %v49_v10 = vld [vmem:[#allocation5 + $0x20] sm:$0xff]  ;;  %v51_v11 = vld [vmem:[#allocation5 + $0x30] sm:$0xff]  ;;  %v56_v16 = vshrl.u32 %v55_v15, 7 }
  0x2a   :  { %v197_v9 = vpack.c.bf16 %v52_v7, %v50_v6  ;;  %194 = vmatprep.subr.bf16.mxu0 %v193_v4  ;;  %201 = vmatprep.subr.bf16.mxu1 %v193_v4  ;;  %v199_v12 = vpack.c.bf16 %v51_v11, %v49_v10  ;;  %v43_v13 = vld [vmem:[#allocation2] sm:$0xff]  ;;  %v44_v14 = vld [vmem:[#allocation2 + $0x8] sm:$0xff] }
  0x2b   :  { %196 = vmatpush1.bf16.msra.mxu0 %v195_v8  ;;  %203 = vmatpush1.bf16.msra.mxu1 %v195_v8  ;;  %v61_v17 = vsub.s32 1, %v56_v16  ;;  %v53_v18 = vld [vmem:[%s372_s2] sm:$0x3]  ;;  %v57_v28 = vsub.s32 0, %v56_v16  ;;  %s300_s2 = smov [#allocation7]  }
  0x2c   :  { %198 = vmatprep.subr.bf16.mxu0 %v197_v9  ;;  %202 = vmatprep.subr.bf16.mxu1 %v197_v9  ;;  %s176_s13 = sshll.u32 %s300_s2, 4  ;;  %s177_s13 = int_to_ptr.vmem [resolvable:$true] %s176_s13 }
  0x2d   :  { %v62_v19 = vrot.slane %v53_v18, %v61_v17  ;;  %v58_v30 = vrot.slane %v53_v18, %v57_v28  ;;  %s265_s14 = scalar_lea.vmem %s177_s13, 256  ;;  %p270_p3 = scmp.lt.s32.totalorder %s177_s13, %s177_s13 }
  0x2e   :  { %p266_p2 = scmp.ne.s32.totalorder %s177_s13, %s265_s14  ;;  %p271_p4 = scmp.lt.s32.totalorder %s265_s14, %s265_s14 }
  0x2f   :  { %200 = vmatpush1.bf16.msra.mxu0 %v199_v12  ;;  %204 = vmatpush1.bf16.msra.mxu1 %v199_v12 }
  0x30   :  { %p272_p5 = por %p271_p4, %p270_p3 }
  0x32   :  { %189 = vmatmul.mubr.msk.f32.vlgmr.msra.gmra.mrb[0].mxu0 %vm65_vm0, %v43_v13  ;;  %190 = vmatmul.mubr.msk.f32.vlgmr.msra.gmra.mrb[0].mxu1 %vm65_vm0, %v44_v14  ;;  %p273_p6 = pnand %p272_p5, %p266_p2 }
 0x105   :  { %v138_v20 = vpop.f32.mrb[0].mxu0  ;;  %v144_v21 = vpop.f32.mrb[0].mxu1 }
 0x106   :  { %v140_v22 = vpop.f32.mrb[1].mxu0  ;;  %v146_v23 = vpop.f32.mrb[1].mxu1  ;;  %v139_v34 = vadd.f32 %v138_v20, %v58_v30  ;;  %v145_v35 = vadd.f32 %v144_v21, %v58_v30 }
 0x107   :  { %v141_v24 = vadd.f32 %v140_v22, %v62_v19  ;;  %v147_v25 = vadd.f32 %v146_v23, %v62_v19 }
 0x108   :  { %v149_v36 = vmax.f32 %v139_v34, 0.0  ;;  %v150_v37 = vmax.f32 %v145_v35, 0.0 }
 0x109   :  { %v191_v26 = vmul.f32 -1.442695, %v141_v24  ;;  %v192_v27 = vmul.f32 -1.442695, %v147_v25 }
 0x10a   :  { %v163_v38 = vsub.f32 %v149_v36, %v43_v13  ;;  %v164_v40 = vsub.f32 %v150_v37, %v44_v14 }
 0x10b   :  { %213 = vpow2.f32 %v191_v26 }
 0x10c   :  { %215 = vpow2.f32 %v192_v27 }
 0x115   :  { %v214_v29 = vpop.eup %213 }
 0x116   :  { %v216_v31 = vpop.eup %215  ;;  %v157_v32 = vadd.f32 1.0, %v214_v29 }
 0x117   :  { %v158_v33 = vadd.f32 1.0, %v216_v31 }
 0x118   :  { %217 = vrcp.f32 %v157_v32 }
 0x119   :  { %219 = vrcp.f32 %v158_v33 }
 0x122   :  { %v218_v39 = vpop.eup %217 }
 0x123   :  { %v220_v41 = vpop.eup %219  ;;  %v165_v42 = vmul.f32 %v218_v39, %v163_v38 }
 0x124   :  { %v166_v43 = vmul.f32 %v220_v41, %v164_v40 }
 0x125   :  { %v167_v44 = vadd.f32 %v165_v42, %v43_v13 }
 0x126   :  { %v168_v45 = vadd.f32 %v166_v43, %v44_v14 }
 0x127   :  { %169 = vst.msk [vmem:[#allocation7] sm:$0xff] %vm65_vm0, %v167_v44 }
 0x128   :  { %170 = vst.msk [vmem:[#allocation7 + $0x8] sm:$0xff] %vm65_vm0, %v168_v45 }
 0x129   :  { %276 = shalt.err (!%p273_p6)
}
 0x12a   :  { %s277_s17 = scalar_lea.hbm %s373_s3, 256 }
 0x12b   :  { %p278_p7 = scmp.ne.s32.totalorder %s373_s3, %s277_s17  ;;  %p281_p8 = scmp.lt.u32.totalorder %s277_s17, %s373_s3 }
 0x12d   :  { %p283_p9 = pnand %p281_p8, %p278_p7 }
 0x12f   :  { %286 = shalt.err (!%p283_p9)
}
 0x130   :  { %182 = dma.vmem_to_hbm [thread:$0]  %s177_s13, 256, %s373_s3, [#allocation4], %s294_s22, %s294_s22, %s295_s23  }
 0x131   :  { %291 = dma.done.wait [#allocation4], 256  }
 0x132   :  { %292 = vsyncadd [#allocation4], 4294967040 }
 0x133   :  { %186 = vsyncpa [#allocation3], 1 }
 0x134   :  { %187 = vsyncpa [#allocation6], 1 }
 0x135   :  { %188 = vsyncpa [#allocation4], 1 }

</bundles_post_ra>
